<compile_context>
chip_gen: v6e
topology: v6e:2x2x1
jax: 0.10.0
libtpu: 0.0.40
codegen_flags: <defaults>
</compile_context>

<pallas_src>
import functools

import jax
import jax.numpy as jnp
from jax.experimental import pallas as pl
from jax.experimental.pallas import tpu as pltpu


def _round_up(x, m):
    return ((x + m - 1) // m) * m


def _pick_row_tile(n_rows, target):
    t = min(target, _round_up(n_rows, 8))
    return _round_up(t, 8)


_VMEM_LIMIT = 64 * 1024 * 1024


# ----------------------------------------------------------------------------
# Kernel 1: DensePooler linear (y = x @ W^T + b) + F.normalize(dim=-1),
#           with the query attention mask folded in (rows of masked query
#           tokens become exactly zero -> identical final scores).
# ----------------------------------------------------------------------------
def _pooler_kernel(x_ref, wt_ref, b_ref, m_ref, o_ref):
    # x/wt are bf16 (MXU operands), accumulation + normalize in f32.
    y = jnp.dot(x_ref[...], wt_ref[...],
                preferred_element_type=jnp.float32) + b_ref[...]
    ss = jnp.sum(y * y, axis=-1, keepdims=True)
    v = y * jax.lax.rsqrt(jnp.maximum(ss, 1e-24))
    o_ref[...] = (v * m_ref[...]).astype(o_ref.dtype)          # bf16 handoff


def pooler_normalize_mask(x_bf, wt_bf, b2, mask, row_tile=512):
    """x_bf: (M, Din) bf16, wt_bf: (Din, Dout) bf16, b2: (1, Dout) f32,
    mask: (M, 1) f32.  Returns masked, normalized reps (M, Dout) bf16."""
    M, Din = x_bf.shape
    Dout = wt_bf.shape[1]
    tm = _pick_row_tile(M, row_tile)
    Mp = _round_up(M, tm)
    if Mp != M:
        x_bf = jnp.pad(x_bf, ((0, Mp - M), (0, 0)))
        mask = jnp.pad(mask, ((0, Mp - M), (0, 0)))
    out = pl.pallas_call(
        _pooler_kernel,
        out_shape=jax.ShapeDtypeStruct((Mp, Dout), jnp.bfloat16),
        grid=(Mp // tm,),
        in_specs=[
            pl.BlockSpec((tm, Din), lambda i: (i, 0)),
            pl.BlockSpec((Din, Dout), lambda i: (0, 0)),
            pl.BlockSpec((1, Dout), lambda i: (0, 0)),
            pl.BlockSpec((tm, 1), lambda i: (i, 0)),
        ],
        out_specs=pl.BlockSpec((tm, Dout), lambda i: (i, 0)),
        compiler_params=pltpu.CompilerParams(
            dimension_semantics=("parallel",),
            vmem_limit_bytes=_VMEM_LIMIT),
    )(x_bf, wt_bf, b2, mask)
    return out[:M]


# ----------------------------------------------------------------------------
# Kernel 2: fused passage path:
#           DensePooler + normalize + Quantization.forward (eval value).
#           PQ center selection and codebook selection use block-diagonal
#           MXU matmuls; discrete selections are compared in f32.
# ----------------------------------------------------------------------------
def _passage_kernel(x_ref, wt_ref, b_ref, p_ref, pn2_ref, cbip_ref, cbg_ref,
                    cbn2_ref, o_ref, *, num_codebook, num_codeword):
    f32 = jnp.float32
    bf16 = jnp.bfloat16

    # --- DensePooler (tied linear) + F.normalize(dim=-1) --------------------
    y = jnp.dot(x_ref[...], wt_ref[...],
                preferred_element_type=f32) + b_ref[...]
    v = y * jax.lax.rsqrt(jnp.maximum(jnp.sum(y * y, axis=-1, keepdims=True),
                                      1e-24))                        # (N, D) f32

    # --- Quantization.pq_selection (rotate_vec identity) ---------------------
    # v is unit-norm so ||v||^2 is constant over centers: argmax of
    # -(||v||^2 + ||P_j||^2 - 2<v,P_j>) == argmax of (2<v,P_j> - ||P_j||^2).
    ip = jnp.einsum('nd,pd->np', v.astype(bf16), p_ref[...],
                    preferred_element_type=f32)                     # (N, num_pq)
    score_pq = 2.0 * ip - pn2_ref[...]                              # f32 compare
    it = jax.lax.broadcasted_iota(jnp.int32, score_pq.shape, 1)
    m = jnp.max(score_pq, axis=-1, keepdims=True)
    sel = jnp.min(jnp.where(score_pq == m, it, score_pq.shape[-1]),
                  axis=-1, keepdims=True)                           # first index
    onehot = (it == sel).astype(bf16)                               # exact 0/1
    centers = jnp.dot(onehot, p_ref[...],
                      preferred_element_type=f32)                   # exact rows
    centered = v - centers                                          # (N, D) f32

    # --- code_selection + STEstimator fwd + quantized_vecs -------------------
    # Eval path: argmax(softmax(proba/0.01)) == argmin(dist); the soft path is
    # dead compute at inference.  Two block-diagonal matmuls replace the
    # per-codebook unroll; ||vc||^2 is constant over codewords and dropped.
    C, K = num_codebook, num_codeword
    ipc = jnp.dot(centered.astype(bf16), cbip_ref[...],
                  preferred_element_type=f32)                       # (N, C*K)
    score_cb = 2.0 * ipc - cbn2_ref[...]                            # f32 compare
    lane = jax.lax.broadcasted_iota(jnp.int32, score_cb.shape, 1)
    hard = jnp.zeros_like(score_cb)
    # Segmented argmax over the lane-dense scores (one K-wide segment per
    # codebook).  Accumulates into a single one-hot array: no lane slices, no
    # concatenate, no unbounded live set.
    for c in range(C):
        in_seg = jnp.logical_and(lane >= c * K, lane < (c + 1) * K)
        sc = jnp.where(in_seg, score_cb, -jnp.inf)
        mseg = jnp.max(sc, axis=-1, keepdims=True)
        selc = jnp.min(jnp.where(sc == mseg, lane, C * K),
                       axis=-1, keepdims=True)
        hard = hard + (lane == selc).astype(f32)

    qv = jnp.dot(hard.astype(bf16), cbg_ref[...],
                 preferred_element_type=f32)                        # (N, D)

    # normalize(pq_centers + quantized_vecs) — single lane-dense store
    q_full = centers + qv
    ss = jnp.sum(q_full * q_full, axis=-1, keepdims=True)
    o_ref[...] = (q_full * jax.lax.rsqrt(jnp.maximum(ss, 1e-24))
                  ).astype(o_ref.dtype)                             # bf16 handoff


def passage_pool_quantize(x_bf, wt_bf, b2, p_bf, pn2, cbip_bf, cbg_bf, cbn2,
                          num_codebook, num_codeword, row_tile=512):
    """x_bf: (M, Din) bf16 passage hidden states.  Returns (M, Dout) bf16."""
    M, Din = x_bf.shape
    Dout = wt_bf.shape[1]
    num_pq = p_bf.shape[0]
    CK = num_codebook * num_codeword
    tm = _pick_row_tile(M, row_tile)
    Mp = _round_up(M, tm)
    if Mp != M:
        x_bf = jnp.pad(x_bf, ((0, Mp - M), (0, 0)))
    kern = functools.partial(_passage_kernel, num_codebook=num_codebook,
                             num_codeword=num_codeword)
    out = pl.pallas_call(
        kern,
        out_shape=jax.ShapeDtypeStruct((Mp, Dout), jnp.bfloat16),
        grid=(Mp // tm,),
        in_specs=[
            pl.BlockSpec((tm, Din), lambda i: (i, 0)),
            pl.BlockSpec((Din, Dout), lambda i: (0, 0)),
            pl.BlockSpec((1, Dout), lambda i: (0, 0)),
            pl.BlockSpec((num_pq, Dout), lambda i: (0, 0)),
            pl.BlockSpec((1, num_pq), lambda i: (0, 0)),
            pl.BlockSpec((Dout, CK), lambda i: (0, 0)),
            pl.BlockSpec((CK, Dout), lambda i: (0, 0)),
            pl.BlockSpec((1, CK), lambda i: (0, 0)),
        ],
        out_specs=pl.BlockSpec((tm, Dout), lambda i: (i, 0)),
        compiler_params=pltpu.CompilerParams(
            dimension_semantics=("parallel",),
            vmem_limit_bytes=_VMEM_LIMIT),
    )(x_bf, wt_bf, b2, p_bf, pn2, cbip_bf, cbg_bf, cbn2)
    return out[:M]


# ----------------------------------------------------------------------------
# Kernel 3: compute_similarity (ColBERT MaxSim).  q_mask is already folded
#           into q_reps; grid processes up to 8 batch items per step.
# ----------------------------------------------------------------------------
def _maxsim_kernel(q_ref, p_ref, pm_ref, o_ref):
    s = jnp.einsum('bqd,bkd->bqk', q_ref[...], p_ref[...],
                   preferred_element_type=jnp.float32)      # (Bt, Lq, Lp)
    s = s + (1.0 - pm_ref[...]) * (-1000.0)                 # p_mask additive
    vals = jnp.max(s, axis=-1)                              # max over Lp
    o_ref[...] = jnp.sum(vals, axis=-1, keepdims=True)      # sum over Lq


def maxsim(q_reps, p_reps, p_mask, batch_tile=8):
    B, Lq, D = q_reps.shape
    Lp = p_reps.shape[1]
    Bt = min(batch_tile, B)
    Bp = _round_up(B, Bt)
    pm = p_mask.astype(jnp.float32).reshape(B, 1, Lp)
    if Bp != B:
        q_reps = jnp.pad(q_reps, ((0, Bp - B), (0, 0), (0, 0)))
        p_reps = jnp.pad(p_reps, ((0, Bp - B), (0, 0), (0, 0)))
        pm = jnp.pad(pm, ((0, Bp - B), (0, 0), (0, 0)))
    out = pl.pallas_call(
        _maxsim_kernel,
        out_shape=jax.ShapeDtypeStruct((Bp, 1), jnp.float32),
        grid=(Bp // Bt,),
        in_specs=[
            pl.BlockSpec((Bt, Lq, D), lambda b: (b, 0, 0)),
            pl.BlockSpec((Bt, Lp, D), lambda b: (b, 0, 0)),
            pl.BlockSpec((Bt, 1, Lp), lambda b: (b, 0, 0)),
        ],
        out_specs=pl.BlockSpec((Bt, 1), lambda b: (b, 0)),
        compiler_params=pltpu.CompilerParams(
            dimension_semantics=("parallel",),
            vmem_limit_bytes=_VMEM_LIMIT),
    )(q_reps, p_reps, pm)
    return out[:B, 0]                                        # .squeeze(1)


# ----------------------------------------------------------------------------
# ColBertModel eval forward (pallas-backed)
# ----------------------------------------------------------------------------
def colbert_forward(params, q_hidden, p_hidden, q_mask, p_mask, row_tile=512):
    B, Lq, Din = q_hidden.shape
    _, Lp, _ = p_hidden.shape
    W, b = params['pooler_w'], params['pooler_b']
    Dout = W.shape[0]
    cb = params['codebooks']
    C, K, S = cb.shape
    assert C * S == Dout

    # --- one-time parameter prep (layout plumbing, bf16 MXU operands) -------
    bf16, f32 = jnp.bfloat16, jnp.float32
    wt_bf = W.T.astype(bf16)
    b2 = b.reshape(1, Dout).astype(f32)
    p_bf = params['pq_assign'].astype(bf16)                        # (num_pq, D)
    pn2 = jnp.sum(p_bf.astype(f32) ** 2, axis=-1).reshape(1, -1)   # (1, num_pq)
    cb_f = cb.astype(bf16).astype(f32)                             # (C, K, S)
    eye_c = jnp.eye(C, dtype=f32)
    # block-diag (D, C*K): block c = codebooks[c].T  (inner products)
    cbip_bf = jnp.einsum('cks,ce->csek', cb_f, eye_c).reshape(Dout, C * K
                                                              ).astype(bf16)
    # block-diag (C*K, D): block c = codebooks[c]    (gather-back)
    cbg_bf = jnp.einsum('cks,ce->ckes', cb_f, eye_c).reshape(C * K, Dout
                                                             ).astype(bf16)
    cbn2 = jnp.sum(cb_f ** 2, axis=-1).reshape(1, C * K)           # (1, C*K)

    # encode_query: pooler + normalize (+ q_mask folded); rotate_vec identity
    qm = q_mask.astype(f32).reshape(B * Lq, 1)
    q_reps = pooler_normalize_mask(
        q_hidden.reshape(B * Lq, Din).astype(bf16), wt_bf, b2, qm,
        row_tile).reshape(B, Lq, Dout)

    # encode_passage + normalize + pq quantization, fused (no p_reps HBM trip)
    quant_p = passage_pool_quantize(
        p_hidden.reshape(B * Lp, Din).astype(bf16), wt_bf, b2,
        p_bf, pn2, cbip_bf, cbg_bf, cbn2, C, K, row_tile).reshape(B, Lp, Dout)

    return maxsim(q_reps, quant_p, p_mask)                          # (B,)


# ----------------------------------------------------------------------------
# Pure-JAX reference (literal translation of the torch eval math).  The only
# deviation: weights / PQ tables / inputs and the activations feeding the two
# code-selection inner products are rounded to bf16 first, matching the
# kernel's MXU operand precision (per review: bf16 inner products with f32
# accumulation are fine as long as the distance comparison stays in f32 —
# this keeps the discrete code selections in agreement).
# ----------------------------------------------------------------------------
def reference_forward(params, q_hidden, p_hidden, q_mask, p_mask):
    f32, bf16 = jnp.float32, jnp.bfloat16
    rq = lambda a: a.astype(bf16).astype(f32)        # bf16 operand rounding

    W = rq(params['pooler_w'])
    b = params['pooler_b'].astype(f32)
    P = rq(params['pq_assign'])
    cb = rq(params['codebooks'])

    def pool_norm(x):
        y = rq(x) @ W.T + b
        return y / jnp.maximum(jnp.linalg.norm(y, axis=-1, keepdims=True), 1e-12)

    q_reps = pool_norm(q_hidden)
    p_reps = pool_norm(p_hidden)
    D = q_reps.shape[-1]

    # Quantization.forward (eval value)
    v = p_reps.reshape(-1, D)
    vq = rq(v)
    ip = vq @ P.T
    n1 = jnp.sum(vq ** 2, -1, keepdims=True)
    n2 = jnp.sum(P ** 2, -1, keepdims=True)
    simi = -(n1 + n2.T - 2 * ip)
    centers = P[jnp.argmax(simi, axis=-1)]
    centered = v - centers
    C, K, S = cb.shape
    vr = rq(centered).reshape(-1, C, S)
    proba = -jnp.sum((vr[:, :, None, :] - cb[None]) ** 2, -1)
    assign = jax.nn.softmax(proba / 0.01, axis=-1)
    hard = jax.nn.one_hot(jnp.argmax(assign, -1), K, dtype=f32)    # STE fwd value
    qv = jnp.einsum('nck,cks->ncs', hard, cb).reshape(v.shape[0], -1)
    qfull = centers + qv
    qfull = qfull / jnp.maximum(jnp.linalg.norm(qfull, axis=-1, keepdims=True),
                                1e-12)
    quant_p = qfull.reshape(p_reps.shape)

    qm = q_mask.astype(f32)
    pm = p_mask.astype(f32)
    s = jnp.einsum('bqd,bkd->bqk', q_reps, quant_p)
    s = s * qm[:, :, None] + (1 - pm)[:, None, :] * (-1000.0)
    return jnp.sum(jnp.max(s, -1), -1)


# ----------------------------------------------------------------------------
if __name__ == "__main__":
    # small shapes
    B, Lq, Lp = 2, 8, 16
    Din = Dout = 32                  # pooler input_dim / output_dim
    num_pq, num_codebook, num_codeword, subvec = 16, 4, 16, 8   # 4*8 == Dout

    key = jax.random.PRNGKey(0)
    ks = jax.random.split(key, 8)

    params = {
        'pooler_w':  jax.random.uniform(ks[0], (Dout, Din), jnp.float32, -0.1, 0.1),
        'pooler_b':  jax.random.uniform(ks[1], (Dout,),     jnp.float32, -0.1, 0.1),
        'pq_assign': jax.random.uniform(ks[2], (num_pq, num_codebook * subvec),
                                        jnp.float32, -0.1, 0.1),
        'codebooks': jax.random.uniform(ks[3], (num_codebook, num_codeword, subvec),
                                        jnp.float32, -0.1, 0.1),
    }

    q_hidden = jax.random.normal(ks[4], (B, Lq, Din), jnp.float32)
    p_hidden = jax.random.normal(ks[5], (B, Lp, Din), jnp.float32)
    q_mask = jnp.ones((B, Lq), jnp.int32).at[1, -2:].set(0)
    p_mask = jnp.ones((B, Lp), jnp.int32).at[0, -3:].set(0)

    scores = colbert_forward(params, q_hidden, p_hidden, q_mask, p_mask)
    scores = jax.block_until_ready(scores)

    ref = reference_forward(params, q_hidden, p_hidden, q_mask, p_mask)
    assert scores.shape == (B,)
    assert jnp.allclose(jnp.asarray(scores, jnp.float32),
                        jnp.asarray(ref, jnp.float32),
                        rtol=2e-2, atol=2e-2), (scores, ref)

    print("KERNEL_OK")
</pallas_src>

<mosaic_0001>
module attributes {stable_mosaic.version = 11 : i64} {
  func.func @_pooler_kernel(%arg0: i32, %arg1: memref<16x32xbf16, #tpu.memory_space<vmem>>, %arg2: memref<32x32xbf16, #tpu.memory_space<vmem>>, %arg3: memref<1x32xf32, #tpu.memory_space<vmem>>, %arg4: memref<16x1xf32, #tpu.memory_space<vmem>>, %arg5: memref<16x32xbf16, #tpu.memory_space<vmem>>) attributes {dimension_semantics = [#tpu.dimension_semantics<parallel>], iteration_bounds = array<i64: 1>, scalar_prefetch = 0 : i64, scratch_operands = 0 : i64, tpu.core_type = #tpu.core_type<tc>, window_params = [{transform_indices = @transform_0, window_bounds = array<i64: 16, 32>}, {pipeline_mode = #tpu.pipeline_mode<synchronous>, transform_indices = @transform_1, window_bounds = array<i64: 32, 32>}, {pipeline_mode = #tpu.pipeline_mode<synchronous>, transform_indices = @transform_2, window_bounds = array<i64: 1, 32>}, {transform_indices = @transform_3, window_bounds = array<i64: 16, 1>}, {transform_indices = @transform_4, window_bounds = array<i64: 16, 32>}]} {
    %c0 = arith.constant 0 : index
    %c0_0 = arith.constant 0 : index
    %0 = vector.load %arg1[%c0, %c0_0] : memref<16x32xbf16, #tpu.memory_space<vmem>>, vector<16x32xbf16>
    %c0_1 = arith.constant 0 : index
    %c0_2 = arith.constant 0 : index
    %1 = vector.load %arg2[%c0_1, %c0_2] : memref<32x32xbf16, #tpu.memory_space<vmem>>, vector<32x32xbf16>
    %cst = arith.constant dense<0.000000e+00> : vector<16x32xf32>
    %2 = tpu.matmul %0, %1, %cst {dimension_numbers = #tpu.dot_dimension_numbers<[1], [0], [0], [1], [0, 0, 1, 1], [], []>} : vector<16x32xbf16>, vector<32x32xbf16>, vector<16x32xf32> -> vector<16x32xf32>
    %c0_3 = arith.constant 0 : index
    %c0_4 = arith.constant 0 : index
    %3 = vector.load %arg3[%c0_3, %c0_4] : memref<1x32xf32, #tpu.memory_space<vmem>>, vector<1x32xf32>
    %4 = vector.broadcast %3 : vector<1x32xf32> to vector<16x32xf32>
    %5 = arith.addf %2, %4 : vector<16x32xf32>
    %6 = arith.mulf %5, %5 : vector<16x32xf32>
    %cst_5 = arith.constant dense<0.000000e+00> : vector<16xf32>
    %7 = vector.multi_reduction <add>, %6, %cst_5 [1] : vector<16x32xf32> to vector<16xf32>
    %8 = vector.shape_cast %7 : vector<16xf32> to vector<16x1xf32>
    %cst_6 = arith.constant 1.000000e-24 : f32
    %9 = vector.broadcast %cst_6 : f32 to vector<16x1xf32>
    %10 = arith.maximumf %8, %9 : vector<16x1xf32>
    %11 = math.rsqrt %10 : vector<16x1xf32>
    %12 = vector.broadcast %11 : vector<16x1xf32> to vector<16x32xf32>
    %13 = arith.mulf %5, %12 : vector<16x32xf32>
    %c0_7 = arith.constant 0 : index
    %c0_8 = arith.constant 0 : index
    %14 = vector.load %arg4[%c0_7, %c0_8] : memref<16x1xf32, #tpu.memory_space<vmem>>, vector<16x1xf32>
    %15 = vector.broadcast %14 : vector<16x1xf32> to vector<16x32xf32>
    %16 = arith.mulf %13, %15 : vector<16x32xf32>
    %17 = arith.truncf %16 : vector<16x32xf32> to vector<16x32xbf16>
    %c0_9 = arith.constant 0 : index
    %c0_10 = arith.constant 0 : index
    %18 = vector.load %arg5[%c0_9, %c0_10] : memref<16x32xbf16, #tpu.memory_space<vmem>>, vector<16x32xbf16>
    tpu.vector_store %arg5[%c0_9, %c0_10], %17 {strides = array<i32>} : memref<16x32xbf16, #tpu.memory_space<vmem>>, vector<16x32xbf16>,
    return
  }
  func.func @transform_0(%arg0: i32) -> (i32, i32) {
    %c0_i32 = arith.constant 0 : i32
    %c0_i32_0 = arith.constant 0 : i32
    return %arg0, %c0_i32 : i32, i32
  }
  func.func @transform_1(%arg0: i32) -> (i32, i32) {
    %c0_i32 = arith.constant 0 : i32
    %c0_i32_0 = arith.constant 0 : i32
    %c0_i32_1 = arith.constant 0 : i32
    return %c0_i32, %c0_i32_0 : i32, i32
  }
  func.func @transform_2(%arg0: i32) -> (i32, i32) {
    %c0_i32 = arith.constant 0 : i32
    %c0_i32_0 = arith.constant 0 : i32
    %c0_i32_1 = arith.constant 0 : i32
    return %c0_i32, %c0_i32_0 : i32, i32
  }
  func.func @transform_3(%arg0: i32) -> (i32, i32) {
    %c0_i32 = arith.constant 0 : i32
    %c0_i32_0 = arith.constant 0 : i32
    return %arg0, %c0_i32 : i32, i32
  }
  func.func @transform_4(%arg0: i32) -> (i32, i32) {
    %c0_i32 = arith.constant 0 : i32
    %c0_i32_0 = arith.constant 0 : i32
    return %arg0, %c0_i32 : i32, i32
  }
}

</mosaic_0001>

<bundles_post_ra>
// kernel: tpu_custom_call.1
= control target key start
LH: loop header
LB: loop body
LE: loop exit
PB: predicated region body
PF: predicated region fallthrough
CT: control target
= control target key end

     0   :  { %9 = vsyncpa [#allocation3], 0  ;;  %s306_s0 = inlined_call_operand.hbm [shape: bf16[16,32], index: 0, kind: input, shape index: {}]   ;;  %s307_s1 = inlined_call_operand.vmem [shape: bf16[32,32], index: 1, kind: input, shape index: {}]   ;;  %s308_s2 = inlined_call_operand.vmem [shape: f32[1,32], index: 2, kind: input, shape index: {}]   ;;  %s309_s3 = inlined_call_operand.vmem [shape: f32[16,1], index: 3, kind: input, shape index: {}]   ;;  %s310_s4 = inlined_call_operand.hbm [shape: bf16[16,32], index: 4, kind: output, shape index: {}]  }
   0x1   :  { %10 = vsyncpa [#allocation4], 0  ;;  %s244_s15 = smov [#allocation2]  }
   0x2   :  { %s16_s16 = sshll.u32 %s244_s15, 4  ;;  %s17_s16 = int_to_ptr.vmem [resolvable:$true] %s16_s16 }
   0x3   :  { %s208_s17 = scalar_lea.vmem %s17_s16, 128  ;;  %p213_p1 = scmp.lt.s32.totalorder %s17_s16, %s17_s16 }
   0x4   :  { %p209_p0 = scmp.ne.s32.totalorder %s17_s16, %s208_s17  ;;  %p214_p2 = scmp.lt.s32.totalorder %s208_s17, %s208_s17 }
   0x6   :  { %p215_p3 = por %p214_p2, %p213_p1 }
   0x8   :  { %p216_p4 = pnand %p215_p3, %p209_p0 }
   0xa   :  { %219 = shalt.err (!%p216_p4)
}
   0xb   :  { %s245_s18 = smov 64   ;;  %s246_s19 = smov 4  }
   0xc   :  { %22 = dma.hbm_to_vmem [thread:$0]  %s306_s0, 128, %s17_s16, [#allocation3], %s245_s18, %s245_s18, %s246_s19  }
   0xd   :  { %240 = dma.done.wait [#allocation3], 128  }
   0xe   :  { %241 = vsyncadd [#allocation3], 4294967168  ;;  %v247_v0 = vmov 0.0   ;;  %vm248_vm0 = vmmov 0   ;;  %v193_v1 = vld [vmem:[%s307_s1 + $0x8] sm:$0xff]   ;;  %v194_v2 = vld [vmem:[%s307_s1] sm:$0xff]  }
   0xf   :  { %176 = vmatprep.subr.bf16.mxu0 %v247_v0  ;;  %180 = vmatprep.mubr.msk.bf16.mxu0 %vm248_vm0, %v247_v0  ;;  %v195_v3 = vld [vmem:[#allocation2] sm:$0xff]   ;;  %vm63_vm1 = vcmask 261120   ;;  %v249_v5 = vmov 0   ;;  %v123_v6 = vld [vmem:[%s309_s3 + $0x8] sm:$0xff]  ;;  %vm144_vm2 = vcmask 257024  }
  0x10   :  { %177 = vmatpush3.bf16.msra.mxu0 %v193_v1  ;;  %v122_v4 = vld [vmem:[%s309_s3] sm:$0xff]  ;;  %191 = vset.pattern.permute.xlu1 %v249_v5 }
  0x11   :  { %178 = vmatprep.subr.bf16.mxu0 %v247_v0  ;;  %192 = vset.pattern.permute.xlu0 %v249_v5  ;;  %v164_v7 = vld [vmem:[%s308_s2] ss:$0 sm:$0xff]  ;;  %s250_s2 = smov [#allocation5]  }
  0x12   :  { %126 = vperm.xlu1 %191, %v122_v4   ;;  %s152_s3 = sshll.u32 %s250_s2, 4  ;;  %s153_s3 = int_to_ptr.vmem [resolvable:$true] %s152_s3 }
  0x13   :  { %s220_s30 = scalar_lea.vmem %s153_s3, 128  ;;  %p225_p6 = scmp.lt.s32.totalorder %s153_s3, %s153_s3 }
  0x14   :  { %179 = vmatpush3.bf16.msra.mxu0 %v194_v2  ;;  %p221_p5 = scmp.ne.s32.totalorder %s153_s3, %s220_s30  ;;  %p226_p7 = scmp.lt.s32.totalorder %s220_s30, %s220_s30 }
  0x16   :  { %131 = vperm.xlu1 %191, %v123_v6   ;;  %p227_p8 = por %p226_p7, %p225_p6 }
  0x17   :  { %181 = vmatmul.mubr.msk.bf16.vlgmr.msra.gmra.mxu0 %vm63_vm1, %v195_v3 }
  0x18   :  { %p228_p9 = pnand %p227_p8, %p221_p5 }
  0x8d   :  { %v127_v23 = vpop.permute.xlu1 %126 }
  0x91   :  { %v132_v29 = vpop.permute.xlu1 %131 }
  0xd7   :  { %v101_v8 = vpop.f32.mrf.mxu0 }
  0xd8   :  { %v102_v9 = vadd.f32 %v164_v7, %v101_v8 }
  0xd9   :  { %v182_v10 = vpop.f32.mrf.mxu0 }
  0xda   :  { %v108_v11 = vmul.f32 %v102_v9, %v102_v9 }
  0xdb   :  { %v104_v12 = vpop.f32.mrf.mxu0 }
  0xdc   :  { %v105_v13 = vadd.f32 %v164_v7, %v104_v12  ;;  %v110_v14 = vsel %vm63_vm1, %v108_v11, 0.0 }
  0xdd   :  { %111 = vadd.xlane.f32.xlu0 %v110_v14  ;;  %v183_v15 = vpop.f32.mrf.mxu0 }
  0xde   :  { %v109_v16 = vmul.f32 %v105_v13, %v105_v13 }
  0xe0   :  { %v113_v17 = vsel %vm63_vm1, %v109_v16, 0.0 }
  0xe1   :  { %114 = vadd.xlane.f32.xlu0 %v113_v17 }
 0x166   :  { %v112_v18 = vpop.xlane.xlu0 %111 }
 0x167   :  { %v116_v19 = vmax.f32 %v112_v18, 1e-24 }
 0x169   :  { %196 = vrsqrt.f32 %v116_v19 }
 0x16a   :  { %v115_v20 = vpop.xlane.xlu0 %114 }
 0x16b   :  { %v117_v21 = vmax.f32 %v115_v20, 1e-24 }
 0x16d   :  { %198 = vrsqrt.f32 %v117_v21 }
 0x176   :  { %v197_v22 = vpop.eup %196 }
 0x177   :  { %v120_v24 = vmul.f32 %v197_v22, %v102_v9 }
 0x179   :  { %v134_v25 = vmul.f32 %v127_v23, %v120_v24 }
 0x17a   :  { %v199_v26 = vpop.eup %198 }
 0x17b   :  { %v171_v27 = vpack.c.bf16 %v134_v25, %v134_v25  ;;  %v121_v28 = vmul.f32 %v199_v26, %v105_v13 }
 0x17d   :  { %v135_v30 = vmul.f32 %v132_v29, %v121_v28  ;;  %145 = vst.msk [vmem:[#allocation5] sm:$0xf] %vm144_vm2, %v171_v27 }
 0x17f   :  { %v172_v31 = vpack.c.bf16 %v135_v30, %v135_v30 }
 0x181   :  { %146 = vst.msk [vmem:[#allocation5 + $0x4] sm:$0xf] %vm144_vm2, %v172_v31 }
 0x182   :  { %231 = shalt.err (!%p228_p9)
}
 0x183   :  { %158 = dma.vmem_to_hbm [thread:$0]  %s153_s3, 128, %s310_s4, [#allocation4], %s245_s18, %s245_s18, %s246_s19  }
 0x184   :  { %242 = dma.done.wait [#allocation4], 128  }
 0x185   :  { %243 = vsyncadd [#allocation4], 4294967168 }
 0x186   :  { %162 = vsyncpa [#allocation3], 1 }
 0x187   :  { %163 = vsyncpa [#allocation4], 1 }

</bundles_post_ra>
